<compile_context>
chip_gen: v6e
topology: v6e:2x2x1
jax: 0.10.0
libtpu: 0.0.40
codegen_flags: <defaults>
</compile_context>

<pallas_src>
import functools

import numpy as np

import jax
import jax.numpy as jnp
from jax import lax
from jax.experimental import pallas as pl
from jax.experimental.pallas import tpu as pltpu


_FULL_FOLD_CAP = 4096   # fold the whole plane into lanes when W < 128 and H*W <= this


def _cdiv(a, b):
    return -(-a // b)


def _round_up(x, m):
    return (x + m - 1) // m * m


def _vmem_capacity_bytes():
    try:
        return int(pltpu.get_tpu_info().vmem_capacity_bytes)
    except Exception:
        return 64 * 1024 * 1024           # conservative: v7x per-TC VMEM


def _budget_and_limit():
    """Per-operand per-block byte budget and Mosaic vmem_limit_bytes."""
    cap = _vmem_capacity_bytes()
    if cap >= 128 * 1024 * 1024:          # v5e / v6e (128 MiB physical VMEM)
        return 4 * 1024 * 1024, 64 * 1024 * 1024
    # v7x (64 MiB per TC): leave headroom for double buffers + f32 temporaries.
    return 2 * 1024 * 1024, min(48 * 1024 * 1024, (cap * 3) // 4)


# ---------------------------------------------------------------------------
# Folded path: whole plane lives in the lane dim (one plane per sublane row).
# ---------------------------------------------------------------------------
def _gdl_folded_kernel(masks_ref, p_ref, r_ref, out_ref, *, w, pb, planes):
    p = p_ref[...]                        # (pb, L) in the input dtype
    q = r_ref[...]

    # W-gradient: pair (l-1, l) lives at lane l.  masks_ref[0] holds 1/n_w at
    # lanes with l % W != 0 (this also zeroes the roll wrap at l == 0), else 0.
    dpw = p - pltpu.roll(p, 1, axis=1)
    dqw = q - pltpu.roll(q, 1, axis=1)
    d = jnp.abs(jnp.abs(dpw) - jnp.abs(dqw)).astype(jnp.float32)
    acc = d * masks_ref[0:1, :]

    # H-gradient: pair (l-W, l) lives at lane l (same plane, since the whole
    # plane is folded).  masks_ref[1] holds 1/n_h at lanes l >= W, else 0.
    dph = p - pltpu.roll(p, w, axis=1)
    dqh = q - pltpu.roll(q, w, axis=1)
    d = jnp.abs(jnp.abs(dph) - jnp.abs(dqh)).astype(jnp.float32)
    acc = acc + d * masks_ref[1:2, :]

    # Tail block of the cdiv grid: select away garbage (out-of-range) planes.
    if planes % pb != 0:
        valid = planes - pl.program_id(0) * pb
        row = lax.broadcasted_iota(jnp.int32, acc.shape, 0)
        acc = jnp.where(row < valid, acc, 0.0)

    total = jnp.sum(jnp.sum(acc, axis=0, keepdims=True), axis=1, keepdims=True)
    out_ref[...] = jnp.broadcast_to(total.reshape(1, 1, 1), out_ref.shape)


# ---------------------------------------------------------------------------
# Native-layout path (W >= 128 or very large planes): (planes, H, W) blocks.
# ---------------------------------------------------------------------------
def _gdl_native_kernel(p_ref, r_ref, out_ref, *, inv_nh, inv_nw, pb, planes):
    p = p_ref[...]                        # (pb, H, W)
    q = r_ref[...]

    # W-gradient via a lane roll; zero the wrap / first-column lane.
    dpw = p - pltpu.roll(p, 1, axis=2)
    dqw = q - pltpu.roll(q, 1, axis=2)
    d_w = jnp.abs(jnp.abs(dpw) - jnp.abs(dqw)).astype(jnp.float32)
    lane = lax.broadcasted_iota(jnp.int32, d_w.shape, 2)
    d_w = jnp.where(lane == 0, 0.0, d_w)

    # H-gradient via sublane-offset slices (always within one plane).
    # TODO(synk): tile inside a plane (row blocks + 1-row halo) when a single
    # plane exceeds the per-block VMEM budget instead of loading it whole.
    dph = p[:, 1:, :] - p[:, :-1, :]
    dqh = q[:, 1:, :] - q[:, :-1, :]
    d_h = jnp.abs(jnp.abs(dph) - jnp.abs(dqh)).astype(jnp.float32)

    if planes % pb != 0:
        valid = planes - pl.program_id(0) * pb
        pid = lax.broadcasted_iota(jnp.int32, d_w.shape, 0)
        d_w = jnp.where(pid < valid, d_w, 0.0)
        pid_h = lax.broadcasted_iota(jnp.int32, d_h.shape, 0)
        d_h = jnp.where(pid_h < valid, d_h, 0.0)

    def _tot3(x):                         # full sum of a rank-3 array -> (1, 1, 1)
        x = jnp.sum(x, axis=0, keepdims=True)
        x = jnp.sum(x, axis=1, keepdims=True)
        return jnp.sum(x, axis=2, keepdims=True)

    s = jnp.float32(inv_nw) * _tot3(d_w) + jnp.float32(inv_nh) * _tot3(d_h)
    out_ref[...] = jnp.broadcast_to(s, out_ref.shape)


# ---------------------------------------------------------------------------
# Wrapper
# ---------------------------------------------------------------------------
def gdl_loss(produce_img, real_img):
    """GDL loss for NCHW inputs (matches GDLLoss.forward). Returns f32 scalar."""
    assert produce_img.shape == real_img.shape
    assert produce_img.dtype == real_img.dtype
    n, c, h, w = produce_img.shape
    planes = n * c

    n_h = planes * (h - 1) * w
    n_w = planes * h * (w - 1)
    if n_h == 0 or n_w == 0:
        # nn.L1Loss(reduction='mean') over an empty tensor is nan; nan + x = nan.
        return jnp.float32(float("nan"))
    inv_nh = 1.0 / n_h
    inv_nw = 1.0 / n_w

    itemsize = jnp.dtype(produce_img.dtype).itemsize
    budget, vmem_limit = _budget_and_limit()
    cparams = pltpu.CompilerParams(
        dimension_semantics=("parallel",),      # per-block partials -> both v7x TCs
        vmem_limit_bytes=vmem_limit,
    )

    use_fold = (w < 128) and (h * w <= _FULL_FOLD_CAP)

    if use_fold:
        # ---- lane-dense folded layout: one whole plane per sublane row ----
        lanes = h * w
        lane_bytes = _round_up(lanes, 128) * itemsize
        max_rows = max(8, budget // lane_bytes)

        if planes < 16:
            # Tiny inputs: zero-pad the plane axis (zero planes contribute 0),
            # keeping 8-aligned sublane blocks and >= 2 blocks for megacore.
            planes_p, pb = 16, 8
        elif planes <= max_rows:
            planes_p, pb = planes, _round_up(_cdiv(planes, 2), 8)
        else:
            planes_p, pb = planes, (max_rows // 8) * 8
        num_blocks = _cdiv(planes_p, pb)

        p2 = produce_img.reshape(planes, lanes)
        r2 = real_img.reshape(planes, lanes)
        if planes_p != planes:
            p2 = jnp.pad(p2, ((0, planes_p - planes), (0, 0)))
            r2 = jnp.pad(r2, ((0, planes_p - planes), (0, 0)))

        # Pre-scaled static masks: row 0 = W-gradient (pair (l-1, l); zero at
        # fold seams and the roll wrap), row 1 = H-gradient (pair (l-W, l)).
        lane = np.arange(lanes)
        mask_w = np.where(lane % w != 0, inv_nw, 0.0)
        mask_h = np.where(lane >= w, inv_nh, 0.0)
        masks = jnp.asarray(np.stack([mask_w, mask_h]).astype(np.float32))

        kernel = functools.partial(_gdl_folded_kernel, w=w, pb=pb, planes=planes_p)
        partials = pl.pallas_call(
            kernel,
            out_shape=jax.ShapeDtypeStruct((num_blocks, 8, 128), jnp.float32),
            grid_spec=pltpu.PrefetchScalarGridSpec(
                num_scalar_prefetch=0,
                grid=(num_blocks,),
                in_specs=[
                    pl.BlockSpec((2, lanes), lambda i: (0, 0)),     # masks, resident
                    pl.BlockSpec((pb, lanes), lambda i: (i, 0)),
                    pl.BlockSpec((pb, lanes), lambda i: (i, 0)),
                ],
                out_specs=pl.BlockSpec((1, 8, 128), lambda i: (i, 0, 0)),
            ),
            compiler_params=cparams,
        )(masks, p2, r2)
    else:
        # ---- native-layout path: whole planes per block (free reshape) ----
        plane_bytes = _round_up(h, 8) * _round_up(w, 128) * itemsize
        pb = max(1, budget // plane_bytes)
        pb = min(pb, planes)
        if planes >= 2 and _cdiv(planes, pb) < 2:
            pb = _cdiv(planes, 2)            # >= 2 blocks so both v7x TCs engage
        num_blocks = _cdiv(planes, pb)

        p3 = produce_img.reshape(planes, h, w)
        r3 = real_img.reshape(planes, h, w)

        kernel = functools.partial(
            _gdl_native_kernel, inv_nh=inv_nh, inv_nw=inv_nw, pb=pb, planes=planes)
        partials = pl.pallas_call(
            kernel,
            out_shape=jax.ShapeDtypeStruct((num_blocks, 8, 128), jnp.float32),
            grid_spec=pltpu.PrefetchScalarGridSpec(
                num_scalar_prefetch=0,
                grid=(num_blocks,),
                in_specs=[
                    pl.BlockSpec((pb, h, w), lambda i: (i, 0, 0)),
                    pl.BlockSpec((pb, h, w), lambda i: (i, 0, 0)),
                ],
                out_specs=pl.BlockSpec((1, 8, 128), lambda i: (i, 0, 0)),
            ),
            compiler_params=cparams,
        )(p3, r3)

    return jnp.sum(partials[:, 0, 0])


def _gdl_loss_ref(produce_img, real_img):
    p = produce_img.astype(jnp.float32)
    r = real_img.astype(jnp.float32)
    ph = jnp.abs(p[:, :, 1:, :] - p[:, :, :-1, :])
    rh = jnp.abs(r[:, :, 1:, :] - r[:, :, :-1, :])
    pw = jnp.abs(p[:, :, :, 1:] - p[:, :, :, :-1])
    rw = jnp.abs(r[:, :, :, 1:] - r[:, :, :, :-1])
    return jnp.mean(jnp.abs(ph - rh)) + jnp.mean(jnp.abs(pw - rw))


if __name__ == "__main__":
    key = jax.random.PRNGKey(0)
    k1, k2 = jax.random.split(key)
    B, C, H, W = 2, 4, 16, 16
    produce_img = jax.random.normal(k1, (B, C, H, W), dtype=jnp.float32)
    real_img = jax.random.normal(k2, (B, C, H, W), dtype=jnp.float32)

    out = jax.block_until_ready(gdl_loss(produce_img, real_img))
    ref = jax.block_until_ready(_gdl_loss_ref(produce_img, real_img))

    assert jnp.allclose(out, ref, rtol=1e-5, atol=1e-5), (out, ref)
    print("KERNEL_OK")
</pallas_src>

<mosaic_0001>
module attributes {stable_mosaic.version = 11 : i64} {
  func.func @_gdl_folded_kernel(%arg0: i32, %arg1: memref<2x256xf32, #tpu.memory_space<vmem>>, %arg2: memref<8x256xf32, #tpu.memory_space<vmem>>, %arg3: memref<8x256xf32, #tpu.memory_space<vmem>>, %arg4: memref<1x8x128xf32, #tpu.memory_space<vmem>>) attributes {dimension_semantics = [#tpu.dimension_semantics<parallel>], iteration_bounds = array<i64: 2>, scalar_prefetch = 0 : i64, scratch_operands = 0 : i64, tpu.core_type = #tpu.core_type<tc>, window_params = [{pipeline_mode = #tpu.pipeline_mode<synchronous>, transform_indices = @transform_0, window_bounds = array<i64: 2, 256>}, {transform_indices = @transform_1, window_bounds = array<i64: 8, 256>}, {transform_indices = @transform_2, window_bounds = array<i64: 8, 256>}, {transform_indices = @transform_3, window_bounds = array<i64: 1, 8, 128>}]} {
    %c0 = arith.constant 0 : index
    %c0_0 = arith.constant 0 : index
    %0 = vector.load %arg2[%c0, %c0_0] : memref<8x256xf32, #tpu.memory_space<vmem>>, vector<8x256xf32>
    %c0_1 = arith.constant 0 : index
    %c0_2 = arith.constant 0 : index
    %1 = vector.load %arg3[%c0_1, %c0_2] : memref<8x256xf32, #tpu.memory_space<vmem>>, vector<8x256xf32>
    %c1_i32 = arith.constant 1 : i32
    %2 = tpu.dynamic_rotate %0 by %c1_i32 dim 1 : vector<8x256xf32>, i32 -> vector<8x256xf32>
    %3 = arith.subf %0, %2 : vector<8x256xf32>
    %c1_i32_3 = arith.constant 1 : i32
    %4 = tpu.dynamic_rotate %1 by %c1_i32_3 dim 1 : vector<8x256xf32>, i32 -> vector<8x256xf32>
    %5 = arith.subf %1, %4 : vector<8x256xf32>
    %6 = math.absf %3 : vector<8x256xf32>
    %7 = math.absf %5 : vector<8x256xf32>
    %8 = arith.subf %6, %7 : vector<8x256xf32>
    %9 = math.absf %8 : vector<8x256xf32>
    %c0_4 = arith.constant 0 : index
    %c0_5 = arith.constant 0 : index
    %10 = vector.load %arg1[%c0_4, %c0_5] : memref<2x256xf32, #tpu.memory_space<vmem>>, vector<1x256xf32>
    %11 = vector.broadcast %10 : vector<1x256xf32> to vector<8x256xf32>
    %12 = arith.mulf %9, %11 : vector<8x256xf32>
    %c16_i32 = arith.constant 16 : i32
    %13 = tpu.dynamic_rotate %0 by %c16_i32 dim 1 : vector<8x256xf32>, i32 -> vector<8x256xf32>
    %14 = arith.subf %0, %13 : vector<8x256xf32>
    %c16_i32_6 = arith.constant 16 : i32
    %15 = tpu.dynamic_rotate %1 by %c16_i32_6 dim 1 : vector<8x256xf32>, i32 -> vector<8x256xf32>
    %16 = arith.subf %1, %15 : vector<8x256xf32>
    %17 = math.absf %14 : vector<8x256xf32>
    %18 = math.absf %16 : vector<8x256xf32>
    %19 = arith.subf %17, %18 : vector<8x256xf32>
    %20 = math.absf %19 : vector<8x256xf32>
    %c1 = arith.constant 1 : index
    %c0_7 = arith.constant 0 : index
    %21 = vector.load %arg1[%c1, %c0_7] : memref<2x256xf32, #tpu.memory_space<vmem>>, vector<1x256xf32>
    %22 = vector.broadcast %21 : vector<1x256xf32> to vector<8x256xf32>
    %23 = arith.mulf %20, %22 : vector<8x256xf32>
    %24 = arith.addf %12, %23 : vector<8x256xf32>
    %cst = arith.constant dense<0.000000e+00> : vector<256xf32>
    %25 = vector.multi_reduction <add>, %24, %cst [0] : vector<8x256xf32> to vector<256xf32>
    %26 = vector.shape_cast %25 : vector<256xf32> to vector<1x256xf32>
    %cst_8 = arith.constant dense<0.000000e+00> : vector<1xf32>
    %27 = vector.multi_reduction <add>, %26, %cst_8 [1] : vector<1x256xf32> to vector<1xf32>
    %28 = vector.shape_cast %27 : vector<1xf32> to vector<1x1xf32>
    %29 = vector.shape_cast %28 : vector<1x1xf32> to vector<1x1x1xf32>
    %30 = vector.shape_cast %29 : vector<1x1x1xf32> to vector<1x1x1xf32>
    %31 = vector.broadcast %30 : vector<1x1x1xf32> to vector<1x8x128xf32>
    %c0_9 = arith.constant 0 : index
    %c0_10 = arith.constant 0 : index
    %c0_11 = arith.constant 0 : index
    %32 = vector.load %arg4[%c0_9, %c0_10, %c0_11] : memref<1x8x128xf32, #tpu.memory_space<vmem>>, vector<1x8x128xf32>
    tpu.vector_store %arg4[%c0_9, %c0_10, %c0_11], %31 {strides = array<i32>} : memref<1x8x128xf32, #tpu.memory_space<vmem>>, vector<1x8x128xf32>,
    return
  }
  func.func @transform_0(%arg0: i32) -> (i32, i32) {
    %c0_i32 = arith.constant 0 : i32
    %c0_i32_0 = arith.constant 0 : i32
    %c0_i32_1 = arith.constant 0 : i32
    return %c0_i32, %c0_i32_0 : i32, i32
  }
  func.func @transform_1(%arg0: i32) -> (i32, i32) {
    %c0_i32 = arith.constant 0 : i32
    %c0_i32_0 = arith.constant 0 : i32
    return %arg0, %c0_i32 : i32, i32
  }
  func.func @transform_2(%arg0: i32) -> (i32, i32) {
    %c0_i32 = arith.constant 0 : i32
    %c0_i32_0 = arith.constant 0 : i32
    return %arg0, %c0_i32 : i32, i32
  }
  func.func @transform_3(%arg0: i32) -> (i32, i32, i32) {
    %c0_i32 = arith.constant 0 : i32
    %c0_i32_0 = arith.constant 0 : i32
    %c0_i32_1 = arith.constant 0 : i32
    return %arg0, %c0_i32, %c0_i32_0 : i32, i32, i32
  }
}

</mosaic_0001>

<bundles_post_ra>
// kernel: tpu_custom_call.1
= control target key start
LH: loop header
LB: loop body
LE: loop exit
PB: predicated region body
PF: predicated region fallthrough
CT: control target
= control target key end

     0   :  { %8 = vsyncpa [#allocation3], 0  ;;  %s923_s0 = inlined_call_operand.hbm [shape: f32[2,256], index: 0, kind: input, shape index: {}]   ;;  %s924_s1 = inlined_call_operand.hbm [shape: f32[16,256], index: 1, kind: input, shape index: {}]   ;;  %s925_s2 = inlined_call_operand.hbm [shape: f32[16,256], index: 2, kind: input, shape index: {}]   ;;  %s926_s3 = inlined_call_operand.hbm [shape: f32[2,8,128], index: 3, kind: output, shape index: {}]  }
   0x1   :  { %9 = vsyncpa [#allocation6], 0 }
   0x2   :  { %11 = vsyncpa [#allocation6 + $0x1], 0 }
   0x3   :  { %12 = vsyncpa [#allocation4], 0 }
   0x4   :  { %14 = vsyncpa [#allocation4 + $0x1], 0  ;;  %s717_s12 = smov 0   ;;  %s719_s13 = smov 0  }
   0x5   :  { %s721_s14 = smov 0   ;;  %s723_s15 = smov 0  }
   0x6 LB: > { %s738_s16 = sadd.s32 1, %s689_s15   ;;  %s48_s17 = sadd.s32 1, %s685_s14  ;;  %s689_s15 = sphi %s723_s15, %s951_s15   ;;  %s685_s14 = sphi %s721_s14, %s950_s14   ;;  %s681_s13 = sphi %s719_s13, %s949_s13   ;;  %s677_s12 = sphi %s717_s12, %s948_s12  }
   0x7   : > { %s45_s18 = ssub.s32 %s689_s15, %s738_s16  ;;  %p927_p0 = scmp.ne.s32.totalorder %s685_s14, %s681_s13 }
   0x8   : > { %p46_p1 = scmp.eq.s32.totalorder %s45_s18, 0  ;;  %p56_p2 = scmp.eq.s32.totalorder %s689_s15, 0 }
   0x9   : > { %p501_p4 = scmp.lt.s32.totalorder %s689_s15, 2  ;;  %s148_s20 = sand.u32 1, %s689_s15  }
   0xa   : > { %s749_s19 = scalar_select %p46_p1, %s685_s14, %s48_s17  }
   0xb   : > { %p57_p5 = por %p56_p2, %p927_p0  ;;  %s150_s21 = sand.u32 1, %s685_s14  }
   0xc   : > { %s756_s22 = sshll.u32 %s150_s21, 4  ;;  %s473_s23 = sshll.u32 %s689_s15, 8 }
   0xd   : > { %s764_s26 = scalar_lea.hbm %s924_s1, %s473_s23  ;;  %s152_s27 = scalar_lea.vmem [#allocation5], %s756_s22 }
   0xe   : > { %s160_s28 = sshll.u32 %s152_s27, 4  ;;  %p767_p6 = pnand %p501_p4, %p57_p5  ;;  %s161_s28 = int_to_ptr.vmem [resolvable:$true] %s160_s28 }
   0xf   : > { %s771_s30 = scalar_lea.sflag [#allocation6], %s148_s20  ;;  %s539_s4 = scalar_lea.hbm %s764_s26, 256 }
  0x10   : > { %p540_p7 = scmp.ne.s32.totalorder %s764_s26, %s539_s4  ;;  %p541_p8 = pneg %p767_p6 }
  0x11   : > { %s544_s7 = scalar_lea.hbm %s924_s1, 512  ;;  %p545_p11 = scmp.lt.s32.totalorder %s764_s26, %s924_s1 }
  0x12   : > { %p542_p9 = pnand %p541_p8, %p540_p7  ;;  %p546_p12 = scmp.lt.s32.totalorder %s544_s7, %s539_s4 }
  0x14   : > { %p543_p10 = pneg %p542_p9  ;;  %p547_p13 = por %p546_p12, %p545_p11 }
  0x16   : > { %p548_p1 = pnand %p547_p13, %p543_p10 }
  0x18   : > { %551 = shalt.err (!%p548_p1)
}
  0x19   : > { %s552_s10 = scalar_lea.vmem %s161_s28, 256  ;;  %s691_s11 = smov [#allocation5]  }
  0x1a   : > { %p553_p2 = scmp.ne.s32.totalorder %s161_s28, %s552_s10  ;;  %s557_s17 = sshll.u32 %s691_s11, 4  ;;  %s558_s17 = int_to_ptr.vmem [resolvable:$false] %s557_s17 }
  0x1b   : > { %s559_s18 = scalar_lea.vmem %s558_s17, 512  ;;  %p560_p7 = scmp.lt.s32.totalorder %s161_s28, %s558_s17 }
  0x1c   : > { %p555_p4 = pnand %p553_p2, %p541_p8  ;;  %p561_p9 = scmp.lt.s32.totalorder %s559_s18, %s552_s10 }
  0x1e   : > { %p556_p5 = pneg %p555_p4  ;;  %p562_p3 = por %p561_p9, %p560_p7 }
  0x20   : > { %p563_p0 = pnand %p562_p3, %p556_p5 }
  0x22   : > { %566 = shalt.err (!%p563_p0)
}
  0x23   : > { %492 = dma.hbm_to_vmem [thread:$0]  (!%p767_p6), %s764_s26, 256, %s161_s28, %s771_s30  }
  0x24   : > { %s795_s20 = sadd.s32 4294967295, %s689_s15   ;;  %s454_s21 = sadd.s32 4294967294, %s689_s15  }
  0x25   : > { %p61_p0 = scmp.ne.s32.totalorder %s681_s13, %s677_s12  ;;  %p928_p3 = scmp.eq.s32.totalorder %s795_s20, 0 }
  0x26   : > { %p111_p10 = scmp.eq.s32.totalorder %s795_s20, 1  ;;  %p117_p11 = scmp.eq.s32.totalorder %s454_s21, 1 }
  0x27   : > { %p804_p12 = por %p928_p3, %p61_p0  ;;  %p455_p13 = scmp.ge.s32.totalorder %s689_s15, 1 }
  0x28   : > { %p935_p1 = scmp.ne.s32.totalorder %s685_s14, %s681_s13  ;;  %p816_p4 = por %p117_p11, %p61_p0 }
  0x29   : > { %s934_s24 = scalar_select %p804_p12, 1, 0 }
  0x2a   : > { %p812_p2 = por %p111_p10, %p935_p1  ;;  %p124_p5 = scmp.lt.s32.totalorder %s689_s15, 3 }
  0x2b   : > { %s937_s26 = scalar_select %p816_p4, 1, 0 }
  0x2c   : > { %s936_s25 = scalar_select %p812_p2, 1, 0 }
  0x2d   : > { %s171_s27 = scalar_lea.vmem [#allocation7], %s756_s22  ;;  %s827_s6 = scalar_lea.hbm %s925_s2, %s473_s23 }
  0x2e   : > { %s179_s28 = sshll.u32 %s171_s27, 4  ;;  %p829_p7 = pnand %p455_p13, %p124_p5  ;;  %s180_s28 = int_to_ptr.vmem [resolvable:$true] %s179_s28 }
  0x2f   : > { %s692_s8 = smov [#allocation2]   ;;  %s567_s22 = scalar_lea.hbm %s827_s6, 256 }
  0x30   : > { %s938_s7 = scalar_select %p829_p7, 1, 0 }
  0x31   : > { %s137_s9 = sshll.u32 %s692_s8, 4  ;;  %p568_p0 = scmp.ne.s32.totalorder %s827_s6, %s567_s22  ;;  %s138_s9 = int_to_ptr.vmem [resolvable:$true] %s137_s9 }
  0x32   : > { %s572_s11 = scalar_lea.hbm %s925_s2, 512  ;;  %p573_p13 = scmp.lt.s32.totalorder %s827_s6, %s925_s2 }
  0x33   : > { %p570_p10 = pnand %p568_p0, %p541_p8  ;;  %p574_p1 = scmp.lt.s32.totalorder %s572_s11, %s567_s22 }
  0x35   : > { %p571_p11 = pneg %p570_p10  ;;  %p575_p5 = por %p574_p1, %p573_p13 }
  0x37   : > { %p576_p3 = pnand %p575_p5, %p571_p11 }
  0x39   : > { %579 = shalt.err (!%p576_p3)
}
  0x3a   : > { %s580_s21 = scalar_lea.vmem %s180_s28, 256  ;;  %s693_s27 = smov [#allocation7]  }
  0x3b   : > { %p581_p9 = scmp.ne.s32.totalorder %s180_s28, %s580_s21  ;;  %s585_s4 = sshll.u32 %s693_s27, 4  ;;  %s586_s4 = int_to_ptr.vmem [resolvable:$false] %s585_s4 }
  0x3c   : > { %s587_s5 = scalar_lea.vmem %s586_s4, 512  ;;  %p588_p10 = scmp.lt.s32.totalorder %s180_s28, %s586_s4 }
  0x3d   : > { %p583_p4 = pnand %p581_p9, %p541_p8  ;;  %p589_p2 = scmp.lt.s32.totalorder %s587_s5, %s580_s21 }
  0x3f   : > { %p584_p0 = pneg %p583_p4  ;;  %p590_p12 = por %p589_p2, %p588_p10 }
  0x41   : > { %p591_p7 = pnand %p590_p12, %p584_p0 }
  0x43   : > { %594 = shalt.err (!%p591_p7)
}
  0x44   : > { %495 = dma.hbm_to_vmem [thread:$0]  (!%p767_p6), %s827_s6, 256, %s180_s28, %s771_s30  }
  0x45   : > { %p939_p3 = scmp.eq.s32.totalorder %s795_s20, 0  ;;  %p940_p8 = scmp.ne.s32.totalorder %s938_s7, 0 }
  0x46   : > { %s606_s8 = scalar_lea.vmem %s138_s9, 64  ;;  %p614_p2 = scmp.lt.s32.totalorder %s138_s9, %s138_s9 }
  0x47   : > { %p941_p4 = pneg %p940_p8  ;;  %p607_p13 = scmp.ne.s32.totalorder %s138_s9, %s606_s8 }
  0x48   : > { %p615_p12 = scmp.lt.s32.totalorder %s606_s8, %s606_s8 }
  0x49   : > { %p486_p9 = pnand %p941_p4, %p939_p3 }
  0x4a   : > { %p616_p7 = por %p615_p12, %p614_p2 }
  0x4b   : > { %p597_p11 = pneg %p486_p9 }
  0x4d   : > { %p609_p1 = pnand %p607_p13, %p597_p11 }
  0x4f   : > { %p610_p5 = pneg %p609_p1 }
  0x51   : > { %p617_p0 = pnand %p616_p7, %p610_p5 }
  0x53   : > { %620 = shalt.err (!%p617_p0)
}
  0x54   : > { %488 = dma.hbm_to_vmem [thread:$0]  (!%p486_p9), %s923_s0, 64, %s138_s9, [#allocation3]  }
  0x55   : > { %188 = sbr.rel (%p940_p8) target bundleno = 403 (0x193), region = 32  ;;  %p942_p6 = scmp.eq.s32.totalorder (!%p940_p8), %s795_s20, 0 }
  0x5a   : > { %664 = dma.done.wait (%p942_p6), [#allocation3], 64   ;;  %p943_p10 = pmov %p942_p6 }
  0x5b   : > { %s194_s30 = sand.u32 1, %s795_s20   ;;  %s870_s28 = sand.u32 1, %s681_s13  }
  0x5c   : > { %666 = vsyncadd (%p943_p10), [#allocation3], 4294967232  ;;  %s466_s6 = sshll.u32 %s870_s28, 4  ;;  %s195_s23 = scalar_lea.sflag [#allocation6], %s194_s30 }
  0x5d   : > { %s198_s10 = scalar_lea.vmem [#allocation5], %s466_s6  ;;  %p944_p3 = scmp.ne.s32.totalorder %s934_s24, 0 }
  0x5f   : > { %668 = dma.done.wait (%p944_p3), %s195_s23, 512  }
  0x60   : > { %670 = vsyncadd (%p944_p3), %s195_s23, 4294966784  ;;  %s207_s7 = scalar_lea.vmem [#allocation7], %s466_s6  ;;  %v235_v1 = vld [vmem:[%s198_s10] sm:$0xff]  ;;  %s694_s9 = smov 1   ;;  %v236_v3 = vld [vmem:[%s198_s10 + $0x8] sm:$0xff]  ;;  %v243_v4 = vlaneseq }
  0x61   : > { %v237_v0 = vld [vmem:[%s207_s7] sm:$0xff]  ;;  %239 = vrot.lane.b32.xlu0 %v235_v1, %s694_s9  ;;  %v238_v2 = vld [vmem:[%s207_s7 + $0x8] sm:$0xff]  ;;  %s695_s11 = smov 16   ;;  %s468_s24 = sshll.u32 %s870_s28, 3 }
  0x62   : > { %250 = vrot.lane.b32.xlu1 %v237_v0, %s694_s9  ;;  %v244_v5 = vand.u32 127, %v243_v4  ;;  %v269_v20 = vshrl.u32 %v243_v4, 7  ;;  %v266_v35 = vld [vmem:[#allocation2] ss:$2 sm:$0x3]  ;;  %s234_s17 = scalar_lea.vmem [#allocation8], %s468_s24 }
  0x63   : > { %v306_v38 = vld [vmem:[#allocation2 + $0x1] ss:$2 sm:$0x3]  ;;  %s352_s18 = sshll.u32 %s234_s17, 4  ;;  %s470_s21 = sshll.u32 %s795_s20, 7  ;;  %s883_s18 = int_to_ptr.vmem [resolvable:$true] %s352_s18 }
  0x64   : > { %vm245_vm0 = vcmp.lt.s32.totalorder %v244_v5, 1  ;;  %vm284_vm1 = vcmp.lt.s32.totalorder %v244_v5, 16  ;;  %v270_v31 = vsub.s32 0, %v269_v20  ;;  %v274_v32 = vsub.s32 1, %v269_v20  ;;  %s350_s5 = scalar_lea.hbm %s926_s3, %s470_s21  ;;  %s339_s8 = scalar_lea.sflag [#allocation4], %s870_s28 }
  0x65   : > { %241 = vrot.lane.b32.xlu0 %v236_v3, %s694_s9  ;;  %s621_s29 = scalar_lea.vmem %s883_s18, 128  ;;  %p945_p4 = scmp.ne.s32.totalorder %s936_s25, 0 }
  0x66   : > { %252 = vrot.lane.b32.xlu1 %v238_v2, %s694_s9  ;;  %v271_v45 = vrot.slane %v266_v35, %v270_v31  ;;  %v275_v46 = vrot.slane %v266_v35, %v274_v32  ;;  %v311_v47 = vrot.slane %v306_v38, %v270_v31  ;;  %v315_v48 = vrot.slane %v306_v38, %v274_v32  ;;  %p622_p8 = scmp.ne.s32.totalorder %s883_s18, %s621_s29  ;;  %s696_s22 = smov [#allocation8]  }
  0x67   : > { %s625_s30 = sshll.u32 %s696_s22, 4  ;;  %s626_s30 = int_to_ptr.vmem [resolvable:$false] %s625_s30 }
  0x68   : > { %p623_p9 = pnand %p622_p8, %p945_p4  ;;  %s627_s20 = scalar_lea.vmem %s626_s30, 256 }
  0x69   : > { %280 = vrot.lane.b32.xlu0 %v235_v1, %s695_s11  ;;  %p628_p13 = scmp.lt.s32.totalorder %s883_s18, %s626_s30  ;;  %p629_p1 = scmp.lt.s32.totalorder %s627_s20, %s621_s29 }
  0x6a   : > { %282 = vrot.lane.b32.xlu1 %v236_v3, %s695_s11  ;;  %p624_p11 = pneg %p623_p9 }
  0x6b   : > { %p630_p5 = por %p629_p1, %p628_p13 }
  0x6d   : > { %289 = vrot.lane.b32.xlu0 %v237_v0, %s695_s11  ;;  %p631_p2 = pnand %p630_p5, %p624_p11 }
  0x6e   : > { %291 = vrot.lane.b32.xlu1 %v238_v2, %s695_s11 }
  0xd3   : > { %v240_v7 = vpop.permute.xlu0 %239 }
  0xd4   : > { %v251_v6 = vpop.permute.xlu1 %250 }
  0xd7   : > { %v242_v9 = vpop.permute.xlu0 %241 }
  0xd8   : > { %v253_v8 = vpop.permute.xlu1 %252  ;;  %v246_v12 = vsel %vm245_vm0, %v240_v7, %v242_v9  ;;  %v247_v13 = vsel %vm245_vm0, %v242_v9, %v240_v7 }
  0xd9   : > { %v254_v10 = vsel %vm245_vm0, %v251_v6, %v253_v8  ;;  %v255_v11 = vsel %vm245_vm0, %v253_v8, %v251_v6  ;;  %v248_v16 = vsub.f32 %v235_v1, %v247_v13  ;;  %v249_v17 = vsub.f32 %v236_v3, %v246_v12 }
  0xda   : > { %v256_v14 = vsub.f32 %v237_v0, %v255_v11  ;;  %v257_v15 = vsub.f32 %v238_v2, %v254_v10 }
  0xdb   : > { %v281_v19 = vpop.permute.xlu0 %280  ;;  %v258_v25 = vand.u32 2147483647, %v248_v16  ;;  %v259_v26 = vand.u32 2147483647, %v249_v17 }
  0xdc   : > { %v283_v18 = vpop.permute.xlu1 %282  ;;  %v260_v21 = vand.u32 2147483647, %v256_v14  ;;  %v261_v24 = vand.u32 2147483647, %v257_v15 }
  0xdd   : > { %v285_v22 = vsel %vm284_vm1, %v281_v19, %v283_v18  ;;  %v286_v23 = vsel %vm284_vm1, %v283_v18, %v281_v19 }
  0xde   : > { %v287_v27 = vsub.f32 %v235_v1, %v286_v23  ;;  %v288_v28 = vsub.f32 %v236_v3, %v285_v22  ;;  %v262_v36 = vsub.f32 %v258_v25, %v260_v21  ;;  %v263_v37 = vsub.f32 %v259_v26, %v261_v24 }
  0xdf   : > { %v290_v30 = vpop.permute.xlu0 %289 }
  0xe0   : > { %v292_v29 = vpop.permute.xlu1 %291  ;;  %v297_v41 = vand.u32 2147483647, %v287_v27  ;;  %v298_v42 = vand.u32 2147483647, %v288_v28  ;;  %v264_v49 = vand.u32 2147483647, %v262_v36 }
  0xe1   : > { %v293_v33 = vsel %vm284_vm1, %v290_v30, %v292_v29  ;;  %v294_v34 = vsel %vm284_vm1, %v292_v29, %v290_v30  ;;  %v265_v50 = vand.u32 2147483647, %v263_v37 }
  0xe2   : > { %v295_v39 = vsub.f32 %v237_v0, %v294_v34  ;;  %v296_v40 = vsub.f32 %v238_v2, %v293_v33  ;;  %v278_v55 = vmul.f32 %v271_v45, %v264_v49 }
  0xe3   : > { %v279_v56 = vmul.f32 %v275_v46, %v265_v50 }
  0xe4   : > { %v299_v43 = vand.u32 2147483647, %v295_v39  ;;  %v300_v44 = vand.u32 2147483647, %v296_v40 }
  0xe6   : > { %v301_v51 = vsub.f32 %v297_v41, %v299_v43  ;;  %v302_v52 = vsub.f32 %v298_v42, %v300_v44 }
  0xe8   : > { %v303_v53 = vand.u32 2147483647, %v301_v51  ;;  %v304_v54 = vand.u32 2147483647, %v302_v52 }
  0xea   : > { %v318_v57 = vmul.f32 %v311_v47, %v303_v53  ;;  %v319_v58 = vmul.f32 %v315_v48, %v304_v54 }
  0xec   : > { %v320_v59 = vadd.f32 %v318_v57, %v278_v55  ;;  %v321_v60 = vadd.f32 %v319_v58, %v279_v56 }
  0xee   : > { %v322_v61 = vrot.slane %v320_v59, 4  ;;  %v328_v62 = vrot.slane %v321_v60, 4 }
  0xf0   : > { %v323_v63 = vadd.f32 %v322_v61, %v320_v59  ;;  %v329_v0 = vadd.f32 %v328_v62, %v321_v60 }
  0xf2   : > { %v324_v1 = vrot.slane %v323_v63, 2  ;;  %v330_v2 = vrot.slane %v329_v0, 2 }
  0xf4   : > { %v325_v3 = vadd.f32 %v324_v1, %v323_v63  ;;  %v331_v4 = vadd.f32 %v330_v2, %v329_v0 }
  0xf6   : > { %v326_v5 = vrot.slane %v325_v3, 1  ;;  %v332_v6 = vrot.slane %v331_v4, 1 }
  0xf8   : > { %v327_v7 = vadd.f32 %v326_v5, %v325_v3  ;;  %v333_v8 = vadd.f32 %v332_v6, %v331_v4 }
  0xfa   : > { %v334_v9 = vadd.f32 %v333_v8, %v327_v7 }
  0xfc   : > { %335 = vadd.xlane.f32.xlu0 %v334_v9 }
 0x185   : > { %v336_v10 = vpop.xlane.xlu0 %335 }
 0x186   : > { %337 = vst [vmem:[%s234_s17] sm:$0xff] %v336_v10 }
 0x187   : > { %634 = shalt.err (!%p631_p2)
}
 0x188   : > { %s635_s6 = scalar_lea.hbm %s350_s5, 128  ;;  %s639_s10 = scalar_lea.hbm %s926_s3, 256 }
 0x189   : > { %p636_p12 = scmp.ne.s32.totalorder %s350_s5, %s635_s6  ;;  %p640_p6 = scmp.lt.s32.totalorder %s350_s5, %s926_s3 }
 0x18a   : > { %p641_p10 = scmp.lt.s32.totalorder %s639_s10, %s635_s6 }
 0x18b   : > { %p637_p7 = pnand %p636_p12, %p945_p4 }
 0x18c   : > { %p642_p3 = por %p641_p10, %p640_p6 }
 0x18d   : > { %p638_p0 = pneg %p637_p7 }
 0x18f   : > { %p643_p8 = pnand %p642_p3, %p638_p0 }
 0x191   : > { %646 = shalt.err (!%p643_p8)
}
 0x192   : > { %483 = dma.vmem_to_hbm [thread:$0]  (%p945_p4), %s883_s18, 128, %s350_s5, %s339_s8  }
 0x193 PF: > { %s364_s11 = sand.u32 1, %s677_s12   ;;  %p946_p9 = scmp.ne.s32.totalorder %s937_s26, 0 }
 0x194   : > { %p947_p11 = scmp.ge.s32.totalorder %s689_s15, 2  ;;  %s365_s24 = scalar_lea.sflag [#allocation4], %s364_s11 }
 0x196   : > { %p497_p13 = pnand %p947_p11, %p946_p9 }
 0x198   : > { %p498_p1 = pneg %p497_p13 }
 0x19a   : > { %672 = dma.done.wait (%p498_p1), %s365_s24, 128  }
 0x19b   : > { %674 = vsyncadd (%p498_p1), %s365_s24, 4294967168  ;;  %p17_p5 = scmp.ge.s32.totalorder %s738_s16, 4   ;;  %s948_s12 = smov %s681_s13 }
 0x19c   : > { %s949_s13 = smov %s685_s14  ;;  %s950_s14 = smov %s749_s19 }
 0x19d   : > { %s951_s15 = smov %s738_s16  ;;  %19 = sbr.rel (!%p17_p5) target bundleno = 6 (0x6), region = 94 }
 0x1a2   :  { %370 = vsyncpa [#allocation3], 1 }
 0x1a3   :  { %372 = vsyncpa [#allocation3 + $0x1], 1 }
 0x1a4   :  { %373 = vsyncpa [#allocation6], 1 }
 0x1a5   :  { %375 = vsyncpa [#allocation6 + $0x1], 1 }
 0x1a6   :  { %376 = vsyncpa [#allocation4], 1 }
 0x1a7   :  { %378 = vsyncpa [#allocation4 + $0x1], 1 }

</bundles_post_ra>
